<compile_context>
chip_gen: v5e
topology: v5e:2x2
jax: 0.10.0
libtpu: 0.0.40
codegen_flags: <defaults>
</compile_context>

<pallas_src>
import functools
import math

import jax
import jax.numpy as jnp
from jax.experimental import pallas as pl
from jax.experimental.pallas import tpu as pltpu


# ----------------------------- fused kernel ---------------------------------

def _pos_emb_cross_attn_kernel(
    x_ref, wt_ref, bt_ref, wtq_ref, btq_ref, kt_ref, v_ref,
    wo_ref, bo_ref, gamma_ref, beta_ref, o_ref,
    *, num_heads, eps, keep_mag):
    E = wt_ref.shape[1]
    Dh = E // num_heads

    x = x_ref[...]                                                   # (B*L, T)

    # ts_proj output (needed for the residual path)
    xp = jnp.dot(x, wt_ref[...], preferred_element_type=jnp.float32) + bt_ref[...]

    # Q straight from x through the folded (Wt @ Wq * 1/sqrt(Dh)) weights
    q = jnp.dot(x, wtq_ref[...], preferred_element_type=jnp.float32) + btq_ref[...]

    # All-heads attention.  K^T (E, L) and V (L, E) are batch-invariant and
    # precomputed in the wrapper, so all B*L query rows run as one M dim.
    heads = []
    for h in range(num_heads):
        lo = h * Dh
        s = jnp.dot(q[:, lo:lo + Dh], kt_ref[lo:lo + Dh, :],
                    preferred_element_type=jnp.float32)              # (B*L, L)
        s = s - jnp.max(s, axis=-1, keepdims=True)                   # stable softmax
        p = jnp.exp(s)
        p = p * pl.reciprocal(jnp.sum(p, axis=-1, keepdims=True), approx=True)
        heads.append(jnp.dot(p, v_ref[:, lo:lo + Dh],
                             preferred_element_type=jnp.float32))    # (B*L, Dh)
    attn = jnp.concatenate(heads, axis=-1)                           # (B*L, E)

    # single output-projection matmul
    pos_out = (jnp.dot(attn, wo_ref[...], preferred_element_type=jnp.float32)
               + bo_ref[...])

    # residual + LayerNorm (population variance, affine)
    z = xp + pos_out
    mu = jnp.mean(z, axis=-1, keepdims=True)
    var = jnp.mean(jnp.square(z - mu), axis=-1, keepdims=True)
    ln = (z - mu) * jax.lax.rsqrt(var + eps) * gamma_ref[...] + beta_ref[...]
    o_ref[...] = (z + ln) * 0.5 if keep_mag else ln


# ----------------------------- wrapper ---------------------------------------

def pos_emb_cross_attn(x, params, *, num_heads, keep_mag=False, eps=1e-5):
    B, L, T = x.shape
    E = params["wt"].shape[1]
    assert E % num_heads == 0
    Dh = E // num_heads
    scale = 1.0 / math.sqrt(Dh)

    # ---- batch-invariant precomputation, hoisted out of the kernel ----
    kv = params["pos"] @ params["wkv"] + params["bkv"]               # (L, 2E)
    kt = kv[:, :E].T                                                 # (E, L)
    v = kv[:, E:]                                                    # (L, E)
    wtq = (params["wt"] @ params["wq"]) * scale                      # (T, E)
    btq = (params["bt"] @ params["wq"] + params["bq"]) * scale       # (1, E)

    N = B * L
    x2d = x.reshape(N, T)

    def full(shape):
        return pl.BlockSpec(shape, lambda i, _n=len(shape): (0,) * _n)

    kernel = functools.partial(_pos_emb_cross_attn_kernel,
                               num_heads=num_heads, eps=eps, keep_mag=keep_mag)
    out2d = pl.pallas_call(
        kernel,
        grid=(1,),                                   # single step: whole problem
        in_specs=[
            full((N, T)),                            # x, flattened over batch
            full((T, E)),                            # ts_proj weight
            full((1, E)),                            # ts_proj bias
            full((T, E)),                            # folded Wt@Wq*scale
            full((1, E)),                            # folded (bt@Wq+bq)*scale
            full((E, L)),                            # K^T (precomputed)
            full((L, E)),                            # V (precomputed)
            full((E, E)),                            # out_proj weight
            full((1, E)),                            # out_proj bias
            full((1, E)),                            # layernorm gamma
            full((1, E)),                            # layernorm beta
        ],
        out_specs=full((N, E)),
        out_shape=jax.ShapeDtypeStruct((N, E), jnp.float32),
        compiler_params=pltpu.CompilerParams(
            dimension_semantics=("arbitrary",)),
    )(x2d, params["wt"], params["bt"], wtq, btq, kt, v,
      params["wo"], params["bo"], params["gamma"], params["beta"])
    return out2d.reshape(B, L, E)


# ----------------------------- pure-JAX reference ----------------------------

def reference(x, params, *, num_heads, keep_mag=False, eps=1e-5):
    B, L, T = x.shape
    E = params["wt"].shape[1]
    Dh = E // num_heads
    xp = x @ params["wt"] + params["bt"]
    kv = params["pos"] @ params["wkv"] + params["bkv"]
    k, v = kv[:, :E], kv[:, E:]
    q = xp @ params["wq"] + params["bq"]
    qh = q.reshape(B, L, num_heads, Dh).transpose(0, 2, 1, 3)        # (B,H,L,Dh)
    kh = k.reshape(L, num_heads, Dh).transpose(1, 0, 2)              # (H,L,Dh)
    vh = v.reshape(L, num_heads, Dh).transpose(1, 0, 2)
    s = jnp.einsum("bhid,hjd->bhij", qh, kh) / math.sqrt(Dh)
    p = jax.nn.softmax(s, axis=-1)
    o = jnp.einsum("bhij,hjd->bhid", p, vh).transpose(0, 2, 1, 3).reshape(B, L, E)
    pos_out = o @ params["wo"] + params["bo"]
    z = xp + pos_out
    mu = z.mean(-1, keepdims=True)
    var = ((z - mu) ** 2).mean(-1, keepdims=True)
    ln = (z - mu) / jnp.sqrt(var + eps) * params["gamma"] + params["beta"]
    return (z + ln) / 2 if keep_mag else ln


# ----------------------------- main -------------------------------------------

if __name__ == "__main__":
    B, L, T, E, H = 2, 16, 4, 32, 4       # batch, length, ts_dim, emb_dim, heads

    key = jax.random.PRNGKey(0)
    ks = jax.random.split(key, 8)
    w = lambda k, s: jax.random.normal(k, s, jnp.float32) * 0.1
    params = dict(
        wt=w(ks[0], (T, E)),  bt=jnp.zeros((1, E), jnp.float32),
        pos=w(ks[1], (L, E)),
        wq=w(ks[2], (E, E)),  bq=jnp.zeros((1, E), jnp.float32),
        wkv=w(ks[3], (E, 2 * E)), bkv=jnp.zeros((1, 2 * E), jnp.float32),
        wo=w(ks[4], (E, E)),  bo=jnp.zeros((1, E), jnp.float32),
        gamma=jnp.ones((1, E), jnp.float32), beta=jnp.zeros((1, E), jnp.float32),
    )
    x = jax.random.normal(ks[5], (B, L, T), jnp.float32)

    fn = jax.jit(functools.partial(pos_emb_cross_attn, num_heads=H, keep_mag=False))
    out = jax.block_until_ready(fn(x, params))

    ref = reference(x, params, num_heads=H, keep_mag=False)
    assert out.shape == (B, L, E), out.shape
    assert bool(jnp.all(jnp.isfinite(out)))
    assert bool(jnp.allclose(out, ref, atol=1e-2, rtol=1e-2)), \
        float(jnp.max(jnp.abs(out - ref)))
    print("KERNEL_OK")
</pallas_src>

<mosaic_0001>
module attributes {stable_mosaic.version = 11 : i64} {
  func.func @_pos_emb_cross_attn_kernel(%arg0: i32, %arg1: memref<32x4xf32, #tpu.memory_space<vmem>>, %arg2: memref<4x32xf32, #tpu.memory_space<vmem>>, %arg3: memref<1x32xf32, #tpu.memory_space<vmem>>, %arg4: memref<4x32xf32, #tpu.memory_space<vmem>>, %arg5: memref<1x32xf32, #tpu.memory_space<vmem>>, %arg6: memref<32x16xf32, #tpu.memory_space<vmem>>, %arg7: memref<16x32xf32, #tpu.memory_space<vmem>>, %arg8: memref<32x32xf32, #tpu.memory_space<vmem>>, %arg9: memref<1x32xf32, #tpu.memory_space<vmem>>, %arg10: memref<1x32xf32, #tpu.memory_space<vmem>>, %arg11: memref<1x32xf32, #tpu.memory_space<vmem>>, %arg12: memref<32x32xf32, #tpu.memory_space<vmem>>) attributes {dimension_semantics = [#tpu.dimension_semantics<arbitrary>], iteration_bounds = array<i64: 1>, scalar_prefetch = 0 : i64, scratch_operands = 0 : i64, tpu.core_type = #tpu.core_type<tc>, window_params = [{pipeline_mode = #tpu.pipeline_mode<synchronous>, transform_indices = @transform_0, window_bounds = array<i64: 32, 4>}, {pipeline_mode = #tpu.pipeline_mode<synchronous>, transform_indices = @transform_1, window_bounds = array<i64: 4, 32>}, {pipeline_mode = #tpu.pipeline_mode<synchronous>, transform_indices = @transform_2, window_bounds = array<i64: 1, 32>}, {pipeline_mode = #tpu.pipeline_mode<synchronous>, transform_indices = @transform_3, window_bounds = array<i64: 4, 32>}, {pipeline_mode = #tpu.pipeline_mode<synchronous>, transform_indices = @transform_4, window_bounds = array<i64: 1, 32>}, {pipeline_mode = #tpu.pipeline_mode<synchronous>, transform_indices = @transform_5, window_bounds = array<i64: 32, 16>}, {pipeline_mode = #tpu.pipeline_mode<synchronous>, transform_indices = @transform_6, window_bounds = array<i64: 16, 32>}, {pipeline_mode = #tpu.pipeline_mode<synchronous>, transform_indices = @transform_7, window_bounds = array<i64: 32, 32>}, {pipeline_mode = #tpu.pipeline_mode<synchronous>, transform_indices = @transform_8, window_bounds = array<i64: 1, 32>}, {pipeline_mode = #tpu.pipeline_mode<synchronous>, transform_indices = @transform_9, window_bounds = array<i64: 1, 32>}, {pipeline_mode = #tpu.pipeline_mode<synchronous>, transform_indices = @transform_10, window_bounds = array<i64: 1, 32>}, {pipeline_mode = #tpu.pipeline_mode<synchronous>, transform_indices = @transform_11, window_bounds = array<i64: 32, 32>}]} {
    %c0 = arith.constant 0 : index
    %c0_0 = arith.constant 0 : index
    %0 = vector.load %arg1[%c0, %c0_0] : memref<32x4xf32, #tpu.memory_space<vmem>>, vector<32x4xf32>
    %c0_1 = arith.constant 0 : index
    %c0_2 = arith.constant 0 : index
    %1 = vector.load %arg2[%c0_1, %c0_2] : memref<4x32xf32, #tpu.memory_space<vmem>>, vector<4x32xf32>
    %cst = arith.constant dense<0.000000e+00> : vector<32x32xf32>
    %2 = tpu.matmul %0, %1, %cst {dimension_numbers = #tpu.dot_dimension_numbers<[1], [0], [0], [1], [0, 0, 1, 1], [], []>} : vector<32x4xf32>, vector<4x32xf32>, vector<32x32xf32> -> vector<32x32xf32>
    %c0_3 = arith.constant 0 : index
    %c0_4 = arith.constant 0 : index
    %3 = vector.load %arg3[%c0_3, %c0_4] : memref<1x32xf32, #tpu.memory_space<vmem>>, vector<1x32xf32>
    %4 = vector.broadcast %3 : vector<1x32xf32> to vector<32x32xf32>
    %5 = arith.addf %2, %4 : vector<32x32xf32>
    %c0_5 = arith.constant 0 : index
    %c0_6 = arith.constant 0 : index
    %6 = vector.load %arg4[%c0_5, %c0_6] : memref<4x32xf32, #tpu.memory_space<vmem>>, vector<4x32xf32>
    %cst_7 = arith.constant dense<0.000000e+00> : vector<32x32xf32>
    %7 = tpu.matmul %0, %6, %cst_7 {dimension_numbers = #tpu.dot_dimension_numbers<[1], [0], [0], [1], [0, 0, 1, 1], [], []>} : vector<32x4xf32>, vector<4x32xf32>, vector<32x32xf32> -> vector<32x32xf32>
    %c0_8 = arith.constant 0 : index
    %c0_9 = arith.constant 0 : index
    %8 = vector.load %arg5[%c0_8, %c0_9] : memref<1x32xf32, #tpu.memory_space<vmem>>, vector<1x32xf32>
    %9 = vector.broadcast %8 : vector<1x32xf32> to vector<32x32xf32>
    %10 = arith.addf %7, %9 : vector<32x32xf32>
    %11 = vector.extract_strided_slice %10 {offsets = [0, 0], sizes = [32, 8], strides = [1, 1]} : vector<32x32xf32> to vector<32x8xf32>
    %c0_10 = arith.constant 0 : index
    %c0_11 = arith.constant 0 : index
    %12 = vector.load %arg6[%c0_10, %c0_11] : memref<32x16xf32, #tpu.memory_space<vmem>>, vector<8x16xf32>
    %cst_12 = arith.constant dense<0.000000e+00> : vector<32x16xf32>
    %13 = tpu.matmul %11, %12, %cst_12 {dimension_numbers = #tpu.dot_dimension_numbers<[1], [0], [0], [1], [0, 0, 1, 1], [], []>} : vector<32x8xf32>, vector<8x16xf32>, vector<32x16xf32> -> vector<32x16xf32>
    %cst_13 = arith.constant dense<0xFF800000> : vector<32xf32>
    %14 = vector.multi_reduction <maximumf>, %13, %cst_13 [1] : vector<32x16xf32> to vector<32xf32>
    %15 = vector.shape_cast %14 : vector<32xf32> to vector<32x1xf32>
    %16 = vector.broadcast %15 : vector<32x1xf32> to vector<32x16xf32>
    %17 = arith.subf %13, %16 : vector<32x16xf32>
    %18 = math.exp %17 : vector<32x16xf32>
    %cst_14 = arith.constant dense<0.000000e+00> : vector<32xf32>
    %19 = vector.multi_reduction <add>, %18, %cst_14 [1] : vector<32x16xf32> to vector<32xf32>
    %20 = vector.shape_cast %19 : vector<32xf32> to vector<32x1xf32>
    %21 = tpu.reciprocal %20 {approx = true} : vector<32x1xf32> -> vector<32x1xf32>
    %22 = vector.broadcast %21 : vector<32x1xf32> to vector<32x16xf32>
    %23 = arith.mulf %18, %22 : vector<32x16xf32>
    %c0_15 = arith.constant 0 : index
    %c0_16 = arith.constant 0 : index
    %24 = vector.load %arg7[%c0_15, %c0_16] : memref<16x32xf32, #tpu.memory_space<vmem>>, vector<16x8xf32>
    %cst_17 = arith.constant dense<0.000000e+00> : vector<32x8xf32>
    %25 = tpu.matmul %23, %24, %cst_17 {dimension_numbers = #tpu.dot_dimension_numbers<[1], [0], [0], [1], [0, 0, 1, 1], [], []>} : vector<32x16xf32>, vector<16x8xf32>, vector<32x8xf32> -> vector<32x8xf32>
    %26 = vector.extract_strided_slice %10 {offsets = [0, 8], sizes = [32, 8], strides = [1, 1]} : vector<32x32xf32> to vector<32x8xf32>
    %c8 = arith.constant 8 : index
    %c0_18 = arith.constant 0 : index
    %27 = vector.load %arg6[%c8, %c0_18] : memref<32x16xf32, #tpu.memory_space<vmem>>, vector<8x16xf32>
    %cst_19 = arith.constant dense<0.000000e+00> : vector<32x16xf32>
    %28 = tpu.matmul %26, %27, %cst_19 {dimension_numbers = #tpu.dot_dimension_numbers<[1], [0], [0], [1], [0, 0, 1, 1], [], []>} : vector<32x8xf32>, vector<8x16xf32>, vector<32x16xf32> -> vector<32x16xf32>
    %cst_20 = arith.constant dense<0xFF800000> : vector<32xf32>
    %29 = vector.multi_reduction <maximumf>, %28, %cst_20 [1] : vector<32x16xf32> to vector<32xf32>
    %30 = vector.shape_cast %29 : vector<32xf32> to vector<32x1xf32>
    %31 = vector.broadcast %30 : vector<32x1xf32> to vector<32x16xf32>
    %32 = arith.subf %28, %31 : vector<32x16xf32>
    %33 = math.exp %32 : vector<32x16xf32>
    %cst_21 = arith.constant dense<0.000000e+00> : vector<32xf32>
    %34 = vector.multi_reduction <add>, %33, %cst_21 [1] : vector<32x16xf32> to vector<32xf32>
    %35 = vector.shape_cast %34 : vector<32xf32> to vector<32x1xf32>
    %36 = tpu.reciprocal %35 {approx = true} : vector<32x1xf32> -> vector<32x1xf32>
    %37 = vector.broadcast %36 : vector<32x1xf32> to vector<32x16xf32>
    %38 = arith.mulf %33, %37 : vector<32x16xf32>
    %c0_22 = arith.constant 0 : index
    %c8_23 = arith.constant 8 : index
    %39 = vector.load %arg7[%c0_22, %c8_23] : memref<16x32xf32, #tpu.memory_space<vmem>>, vector<16x8xf32>
    %cst_24 = arith.constant dense<0.000000e+00> : vector<32x8xf32>
    %40 = tpu.matmul %38, %39, %cst_24 {dimension_numbers = #tpu.dot_dimension_numbers<[1], [0], [0], [1], [0, 0, 1, 1], [], []>} : vector<32x16xf32>, vector<16x8xf32>, vector<32x8xf32> -> vector<32x8xf32>
    %41 = vector.extract_strided_slice %10 {offsets = [0, 16], sizes = [32, 8], strides = [1, 1]} : vector<32x32xf32> to vector<32x8xf32>
    %c16 = arith.constant 16 : index
    %c0_25 = arith.constant 0 : index
    %42 = vector.load %arg6[%c16, %c0_25] : memref<32x16xf32, #tpu.memory_space<vmem>>, vector<8x16xf32>
    %cst_26 = arith.constant dense<0.000000e+00> : vector<32x16xf32>
    %43 = tpu.matmul %41, %42, %cst_26 {dimension_numbers = #tpu.dot_dimension_numbers<[1], [0], [0], [1], [0, 0, 1, 1], [], []>} : vector<32x8xf32>, vector<8x16xf32>, vector<32x16xf32> -> vector<32x16xf32>
    %cst_27 = arith.constant dense<0xFF800000> : vector<32xf32>
    %44 = vector.multi_reduction <maximumf>, %43, %cst_27 [1] : vector<32x16xf32> to vector<32xf32>
    %45 = vector.shape_cast %44 : vector<32xf32> to vector<32x1xf32>
    %46 = vector.broadcast %45 : vector<32x1xf32> to vector<32x16xf32>
    %47 = arith.subf %43, %46 : vector<32x16xf32>
    %48 = math.exp %47 : vector<32x16xf32>
    %cst_28 = arith.constant dense<0.000000e+00> : vector<32xf32>
    %49 = vector.multi_reduction <add>, %48, %cst_28 [1] : vector<32x16xf32> to vector<32xf32>
    %50 = vector.shape_cast %49 : vector<32xf32> to vector<32x1xf32>
    %51 = tpu.reciprocal %50 {approx = true} : vector<32x1xf32> -> vector<32x1xf32>
    %52 = vector.broadcast %51 : vector<32x1xf32> to vector<32x16xf32>
    %53 = arith.mulf %48, %52 : vector<32x16xf32>
    %c0_29 = arith.constant 0 : index
    %c16_30 = arith.constant 16 : index
    %54 = vector.load %arg7[%c0_29, %c16_30] : memref<16x32xf32, #tpu.memory_space<vmem>>, vector<16x8xf32>
    %cst_31 = arith.constant dense<0.000000e+00> : vector<32x8xf32>
    %55 = tpu.matmul %53, %54, %cst_31 {dimension_numbers = #tpu.dot_dimension_numbers<[1], [0], [0], [1], [0, 0, 1, 1], [], []>} : vector<32x16xf32>, vector<16x8xf32>, vector<32x8xf32> -> vector<32x8xf32>
    %56 = vector.extract_strided_slice %10 {offsets = [0, 24], sizes = [32, 8], strides = [1, 1]} : vector<32x32xf32> to vector<32x8xf32>
    %c24 = arith.constant 24 : index
    %c0_32 = arith.constant 0 : index
    %57 = vector.load %arg6[%c24, %c0_32] : memref<32x16xf32, #tpu.memory_space<vmem>>, vector<8x16xf32>
    %cst_33 = arith.constant dense<0.000000e+00> : vector<32x16xf32>
    %58 = tpu.matmul %56, %57, %cst_33 {dimension_numbers = #tpu.dot_dimension_numbers<[1], [0], [0], [1], [0, 0, 1, 1], [], []>} : vector<32x8xf32>, vector<8x16xf32>, vector<32x16xf32> -> vector<32x16xf32>
    %cst_34 = arith.constant dense<0xFF800000> : vector<32xf32>
    %59 = vector.multi_reduction <maximumf>, %58, %cst_34 [1] : vector<32x16xf32> to vector<32xf32>
    %60 = vector.shape_cast %59 : vector<32xf32> to vector<32x1xf32>
    %61 = vector.broadcast %60 : vector<32x1xf32> to vector<32x16xf32>
    %62 = arith.subf %58, %61 : vector<32x16xf32>
    %63 = math.exp %62 : vector<32x16xf32>
    %cst_35 = arith.constant dense<0.000000e+00> : vector<32xf32>
    %64 = vector.multi_reduction <add>, %63, %cst_35 [1] : vector<32x16xf32> to vector<32xf32>
    %65 = vector.shape_cast %64 : vector<32xf32> to vector<32x1xf32>
    %66 = tpu.reciprocal %65 {approx = true} : vector<32x1xf32> -> vector<32x1xf32>
    %67 = vector.broadcast %66 : vector<32x1xf32> to vector<32x16xf32>
    %68 = arith.mulf %63, %67 : vector<32x16xf32>
    %c0_36 = arith.constant 0 : index
    %c24_37 = arith.constant 24 : index
    %69 = vector.load %arg7[%c0_36, %c24_37] : memref<16x32xf32, #tpu.memory_space<vmem>>, vector<16x8xf32>
    %cst_38 = arith.constant dense<0.000000e+00> : vector<32x8xf32>
    %70 = tpu.matmul %68, %69, %cst_38 {dimension_numbers = #tpu.dot_dimension_numbers<[1], [0], [0], [1], [0, 0, 1, 1], [], []>} : vector<32x16xf32>, vector<16x8xf32>, vector<32x8xf32> -> vector<32x8xf32>
    %71 = tpu.concatenate %25, %40, %55, %70 in 1 : vector<32x8xf32>, vector<32x8xf32>, vector<32x8xf32>, vector<32x8xf32> -> vector<32x32xf32>
    %c0_39 = arith.constant 0 : index
    %c0_40 = arith.constant 0 : index
    %72 = vector.load %arg8[%c0_39, %c0_40] : memref<32x32xf32, #tpu.memory_space<vmem>>, vector<32x32xf32>
    %cst_41 = arith.constant dense<0.000000e+00> : vector<32x32xf32>
    %73 = tpu.matmul %71, %72, %cst_41 {dimension_numbers = #tpu.dot_dimension_numbers<[1], [0], [0], [1], [0, 0, 1, 1], [], []>} : vector<32x32xf32>, vector<32x32xf32>, vector<32x32xf32> -> vector<32x32xf32>
    %c0_42 = arith.constant 0 : index
    %c0_43 = arith.constant 0 : index
    %74 = vector.load %arg9[%c0_42, %c0_43] : memref<1x32xf32, #tpu.memory_space<vmem>>, vector<1x32xf32>
    %75 = vector.broadcast %74 : vector<1x32xf32> to vector<32x32xf32>
    %76 = arith.addf %73, %75 : vector<32x32xf32>
    %77 = arith.addf %5, %76 : vector<32x32xf32>
    %cst_44 = arith.constant dense<0.000000e+00> : vector<32xf32>
    %78 = vector.multi_reduction <add>, %77, %cst_44 [1] : vector<32x32xf32> to vector<32xf32>
    %79 = vector.shape_cast %78 : vector<32xf32> to vector<32x1xf32>
    %cst_45 = arith.constant 3.200000e+01 : f32
    %80 = vector.broadcast %cst_45 : f32 to vector<32x1xf32>
    %81 = arith.divf %79, %80 : vector<32x1xf32>
    %82 = vector.broadcast %81 : vector<32x1xf32> to vector<32x32xf32>
    %83 = arith.subf %77, %82 : vector<32x32xf32>
    %84 = arith.mulf %83, %83 : vector<32x32xf32>
    %cst_46 = arith.constant dense<0.000000e+00> : vector<32xf32>
    %85 = vector.multi_reduction <add>, %84, %cst_46 [1] : vector<32x32xf32> to vector<32xf32>
    %86 = vector.shape_cast %85 : vector<32xf32> to vector<32x1xf32>
    %cst_47 = arith.constant 3.200000e+01 : f32
    %87 = vector.broadcast %cst_47 : f32 to vector<32x1xf32>
    %88 = arith.divf %86, %87 : vector<32x1xf32>
    %89 = vector.broadcast %81 : vector<32x1xf32> to vector<32x32xf32>
    %90 = arith.subf %77, %89 : vector<32x32xf32>
    %cst_48 = arith.constant 9.99999974E-6 : f32
    %91 = vector.broadcast %cst_48 : f32 to vector<32x1xf32>
    %92 = arith.addf %88, %91 : vector<32x1xf32>
    %93 = math.rsqrt %92 : vector<32x1xf32>
    %94 = vector.broadcast %93 : vector<32x1xf32> to vector<32x32xf32>
    %95 = arith.mulf %90, %94 : vector<32x32xf32>
    %c0_49 = arith.constant 0 : index
    %c0_50 = arith.constant 0 : index
    %96 = vector.load %arg10[%c0_49, %c0_50] : memref<1x32xf32, #tpu.memory_space<vmem>>, vector<1x32xf32>
    %97 = vector.broadcast %96 : vector<1x32xf32> to vector<32x32xf32>
    %98 = arith.mulf %95, %97 : vector<32x32xf32>
    %c0_51 = arith.constant 0 : index
    %c0_52 = arith.constant 0 : index
    %99 = vector.load %arg11[%c0_51, %c0_52] : memref<1x32xf32, #tpu.memory_space<vmem>>, vector<1x32xf32>
    %100 = vector.broadcast %99 : vector<1x32xf32> to vector<32x32xf32>
    %101 = arith.addf %98, %100 : vector<32x32xf32>
    %c0_53 = arith.constant 0 : index
    %c0_54 = arith.constant 0 : index
    %102 = vector.load %arg12[%c0_53, %c0_54] : memref<32x32xf32, #tpu.memory_space<vmem>>, vector<32x32xf32>
    tpu.vector_store %arg12[%c0_53, %c0_54], %101 {strides = array<i32>} : memref<32x32xf32, #tpu.memory_space<vmem>>, vector<32x32xf32>,
    return
  }
  func.func @transform_0(%arg0: i32) -> (i32, i32) {
    %c0_i32 = arith.constant 0 : i32
    %c0_i32_0 = arith.constant 0 : i32
    %c0_i32_1 = arith.constant 0 : i32
    return %c0_i32, %c0_i32_0 : i32, i32
  }
  func.func @transform_1(%arg0: i32) -> (i32, i32) {
    %c0_i32 = arith.constant 0 : i32
    %c0_i32_0 = arith.constant 0 : i32
    %c0_i32_1 = arith.constant 0 : i32
    return %c0_i32, %c0_i32_0 : i32, i32
  }
  func.func @transform_2(%arg0: i32) -> (i32, i32) {
    %c0_i32 = arith.constant 0 : i32
    %c0_i32_0 = arith.constant 0 : i32
    %c0_i32_1 = arith.constant 0 : i32
    return %c0_i32, %c0_i32_0 : i32, i32
  }
  func.func @transform_3(%arg0: i32) -> (i32, i32) {
    %c0_i32 = arith.constant 0 : i32
    %c0_i32_0 = arith.constant 0 : i32
    %c0_i32_1 = arith.constant 0 : i32
    return %c0_i32, %c0_i32_0 : i32, i32
  }
  func.func @transform_4(%arg0: i32) -> (i32, i32) {
    %c0_i32 = arith.constant 0 : i32
    %c0_i32_0 = arith.constant 0 : i32
    %c0_i32_1 = arith.constant 0 : i32
    return %c0_i32, %c0_i32_0 : i32, i32
  }
  func.func @transform_5(%arg0: i32) -> (i32, i32) {
    %c0_i32 = arith.constant 0 : i32
    %c0_i32_0 = arith.constant 0 : i32
    %c0_i32_1 = arith.constant 0 : i32
    return %c0_i32, %c0_i32_0 : i32, i32
  }
  func.func @transform_6(%arg0: i32) -> (i32, i32) {
    %c0_i32 = arith.constant 0 : i32
    %c0_i32_0 = arith.constant 0 : i32
    %c0_i32_1 = arith.constant 0 : i32
    return %c0_i32, %c0_i32_0 : i32, i32
  }
  func.func @transform_7(%arg0: i32) -> (i32, i32) {
    %c0_i32 = arith.constant 0 : i32
    %c0_i32_0 = arith.constant 0 : i32
    %c0_i32_1 = arith.constant 0 : i32
    return %c0_i32, %c0_i32_0 : i32, i32
  }
  func.func @transform_8(%arg0: i32) -> (i32, i32) {
    %c0_i32 = arith.constant 0 : i32
    %c0_i32_0 = arith.constant 0 : i32
    %c0_i32_1 = arith.constant 0 : i32
    return %c0_i32, %c0_i32_0 : i32, i32
  }
  func.func @transform_9(%arg0: i32) -> (i32, i32) {
    %c0_i32 = arith.constant 0 : i32
    %c0_i32_0 = arith.constant 0 : i32
    %c0_i32_1 = arith.constant 0 : i32
    return %c0_i32, %c0_i32_0 : i32, i32
  }
  func.func @transform_10(%arg0: i32) -> (i32, i32) {
    %c0_i32 = arith.constant 0 : i32
    %c0_i32_0 = arith.constant 0 : i32
    %c0_i32_1 = arith.constant 0 : i32
    return %c0_i32, %c0_i32_0 : i32, i32
  }
  func.func @transform_11(%arg0: i32) -> (i32, i32) {
    %c0_i32 = arith.constant 0 : i32
    %c0_i32_0 = arith.constant 0 : i32
    %c0_i32_1 = arith.constant 0 : i32
    return %c0_i32, %c0_i32_0 : i32, i32
  }
}

</mosaic_0001>

<bundles_post_ra>
// kernel: pos_emb_cross_attn.1
= control target key start
LH: loop header
LB: loop body
LE: loop exit
PB: predicated region body
PF: predicated region fallthrough
CT: control target
= control target key end

     0   :  { %vm61_vm0 = vcmask 1043456   ;;  %vm48_vm1 = vcmask 31744   ;;  %s1505_s0 = inlined_call_operand.vmem [shape: f32[32,4], index: 0, kind: input, shape index: {}]   ;;  %s1506_s1 = inlined_call_operand.vmem [shape: f32[4,32], index: 1, kind: input, shape index: {}]   ;;  %s1507_s2 = inlined_call_operand.vmem [shape: f32[1,32], index: 2, kind: input, shape index: {}]   ;;  %s1508_s3 = inlined_call_operand.vmem [shape: f32[4,32], index: 3, kind: input, shape index: {}]   ;;  %s1509_s4 = inlined_call_operand.vmem [shape: f32[1,32], index: 4, kind: input, shape index: {}]   ;;  %s1510_s5 = inlined_call_operand.vmem [shape: f32[32,16], index: 5, kind: input, shape index: {}]   ;;  %s1511_s6 = inlined_call_operand.vmem [shape: f32[16,32], index: 6, kind: input, shape index: {}]   ;;  %s1512_s7 = inlined_call_operand.vmem [shape: f32[32,32], index: 7, kind: input, shape index: {}]   ;;  %s1513_s8 = inlined_call_operand.vmem [shape: f32[1,32], index: 8, kind: input, shape index: {}]   ;;  %s1514_s9 = inlined_call_operand.vmem [shape: f32[1,32], index: 9, kind: input, shape index: {}]   ;;  %s1515_s10 = inlined_call_operand.vmem [shape: f32[1,32], index: 10, kind: input, shape index: {}]   ;;  %s1516_s11 = inlined_call_operand.hbm [shape: f32[32,32], index: 11, kind: output, shape index: {}]  }
   0x1   :  { %v43_v0 = vld [vmem:[%s1506_s1] sm:$0xf]  ;;  %v40_v3 = vld [vmem:[%s1505_s0 + $0x8] sm:$0xff] }
   0x2   :  { %v94_v1 = vld [vmem:[%s1508_s3] sm:$0xf]  ;;  %923 = vmatpush.msk.msra.mxu0 %vm61_vm0, %v43_v0  ;;  %969 = vmatpush.msk.msra.mxu3 %vm61_vm0, %v43_v0 }
   0x3   :  { %v39_v2 = vld [vmem:[%s1505_s0] sm:$0xff]  ;;  %970 = vmatpush.msk.msra.mxu1 %vm61_vm0, %v94_v1  ;;  %925 = vmatmul.msk.f32.vlgmr.msra.gmra.mxu3 %vm48_vm1, %v40_v3 }
   0x4   :  { %924 = vmatmul.msk.f32.vlgmr.msra.gmra.mxu0 %vm48_vm1, %v39_v2  ;;  %930 = vmatmul.msk.f32.vlgmr.msra.gmra.mxu1 %vm48_vm1, %v40_v3 }
   0x5   :  { %928 = vmatpush.msk.msrb.mxu0 %vm61_vm0, %v94_v1 }
   0x6   :  { %16 = vsyncpa [#allocation3], 0  ;;  %v41_v4 = vld [vmem:[%s1505_s0 + $0x10] sm:$0xff]  ;;  %v42_v5 = vld [vmem:[%s1505_s0 + $0x18] sm:$0xff]  ;;  %vm132_vm2 = vcmask 64512   ;;  %s1101_s0 = smov 120  }
   0x7   :  { %v131_v6 = vld [vmem:[%s1510_s5] sm:$0xff]  ;;  %s1103_s12 = smov 104   ;;  %v262_v17 = vld [vmem:[%s1510_s5 + $0x8] sm:$0xff]  ;;  %v401_v18 = vld [vmem:[%s1510_s5 + $0x10] sm:$0xff]  ;;  %vm174_vm3 = vcmask 130048   ;;  %s1105_s22 = smov 24  }
   0x8   :  { %971 = vmatpush.msra.mxu2 %v131_v6  ;;  %160 = vmatpush.msra.mxu0 %v131_v6  ;;  %v997_v7 = vld [vmem:[%s1509_s4] ss:$0 sm:$0xff]  ;;  %s1102_s4 = smov 112   ;;  %v538_v19 = vld [vmem:[%s1510_s5 + $0x18] sm:$0xff]  ;;  %s1106_s23 = smov 16   ;;  %vm731_vm4 = vcmask 195584  }
   0x9   :  { %vm744_vm5 = vcmask 261120   ;;  %s911_s16 = sshll.u32 %s1516_s11, 4  ;;  %s1109_s17 = smov 128   ;;  %s912_s16 = int_to_ptr.hbm [resolvable:$true] %s911_s16 }
   0xa   :  { %433 = vmatpush.msrb.mxu2 %v401_v18 }
   0xb   :  { %926 = vmatmul.msk.f32.gmra.mxu3 %vm48_vm1, %v41_v4 }
   0xc   :  { %929 = vmatmul.msk.f32.vlgmr.msrb.gmra.mxu0 %vm48_vm1, %v39_v2  ;;  %931 = vmatmul.msk.f32.gmra.mxu1 %vm48_vm1, %v41_v4 }
   0xd   :  { %294 = vmatpush.msrb.mxu0 %v262_v17 }
  0x13   :  { %927 = vmatmul.msk.f32.gmra.mxu3 %vm48_vm1, %v42_v5 }
  0x14   :  { %932 = vmatmul.msk.f32.gmra.mxu1 %vm48_vm1, %v42_v5 }
  0x81   :  { %v1194_v8 = vpop.f32.mrf.mxu0  ;;  %v122_v9 = vpop.f32.mrf.mxu1 }
  0x82   :  { %v123_v10 = vadd.f32 %v997_v7, %v122_v9 }
  0x84   :  { %934 = vmatmul.msk.f32.vlgmr.msra.gmra.mxu2 %vm132_vm2, %v123_v10 }
  0x89   :  { %v119_v11 = vpop.f32.mrf.mxu0  ;;  %v125_v12 = vpop.f32.mrf.mxu1 }
  0x8a   :  { %v120_v13 = vadd.f32 %v997_v7, %v119_v11  ;;  %v126_v14 = vadd.f32 %v997_v7, %v125_v12 }
  0x8c   :  { %267 = vrot.lane.b32.xlu1 %v126_v14, %s1101_s0  ;;  %935 = vmatmul.msk.f32.gmra.mxu2 %vm132_vm2, %v126_v14 }
  0x8d   :  { %263 = vrot.lane.b32.xlu0 %v120_v13, %s1101_s0  ;;  %933 = vmatmul.msk.f32.vlgmr.msra.gmra.mxu0 %vm132_vm2, %v120_v13 }
  0x8e   :  { %570 = vmatpush.msra.mxu0 %v538_v19 }
  0x91   :  { %v128_v15 = vpop.f32.mrf.mxu1 }
  0x92   :  { %v129_v16 = vadd.f32 %v997_v7, %v128_v15 }
  0x94   :  { %269 = vrot.lane.b32.xlu2 %v129_v16, %s1101_s0  ;;  %936 = vmatmul.msk.f32.gmra.mxu2 %vm132_vm2, %v129_v16 }
  0x95   :  { %402 = vrot.lane.b32.xlu1 %v120_v13, %s1102_s4  ;;  %265 = vrot.lane.b32.xlu0 %v123_v10, %s1101_s0 }
  0x9c   :  { %404 = vrot.lane.b32.xlu2 %v123_v10, %s1102_s4 }
  0x9d   :  { %406 = vrot.lane.b32.xlu1 %v126_v14, %s1102_s4  ;;  %539 = vrot.lane.b32.xlu0 %v120_v13, %s1103_s12 }
  0xa4   :  { %541 = vrot.lane.b32.xlu2 %v123_v10, %s1103_s12 }
  0xa5   :  { %543 = vrot.lane.b32.xlu1 %v126_v14, %s1103_s12  ;;  %408 = vrot.lane.b32.xlu0 %v129_v16, %s1102_s4 }
  0xac   :  { %545 = vrot.lane.b32.xlu2 %v129_v16, %s1103_s12 }
  0xee   :  { %v270_v22 = vpop.permute.xlu2 %269 }
  0xf6   :  { %v405_v29 = vpop.permute.xlu2 %404 }
  0xfe   :  { %v268_v20 = vpop.permute.xlu1 %267  ;;  %v542_v37 = vpop.permute.xlu2 %541 }
  0xff   :  { %v264_v21 = vpop.permute.xlu0 %263 }
 0x100   :  { %941 = vmatmul.msk.f32.vlgmr.msrb.gmra.mxu0 %vm132_vm2, %v264_v21  ;;  %v219_v21 = vld [vmem:[%s1511_s6] sm:$0xff] }
 0x106   :  { %v546_v39 = vpop.permute.xlu2 %545 }
 0x107   :  { %v403_v23 = vpop.permute.xlu1 %402  ;;  %v266_v24 = vpop.permute.xlu0 %265 }
 0x108   :  { %v165_v25 = vpop.f32.mrf.mxu2  ;;  %942 = vmatmul.msk.f32.gmra.mxu0 %vm132_vm2, %v266_v24  ;;  %949 = vmatmul.msk.f32.vlgmr.msrb.gmra.mxu2 %vm132_vm2, %v403_v23 }
 0x109   :  { %v178_v26 = vsel %vm174_vm3, %v165_v25, -inf }
 0x10a   :  { %179 = vmax.xlane.f32.xlu2 %v178_v26  ;;  %v162_v27 = vpop.f32.mrf.mxu0 }
 0x10b   :  { %v175_v28 = vsel %vm174_vm3, %v162_v27, -inf }
 0x10c   :  { %176 = vmax.xlane.f32.xlu0 %v175_v28 }
 0x10f   :  { %v540_v32 = vpop.permute.xlu0 %539  ;;  %v407_v33 = vpop.permute.xlu1 %406 }
 0x110   :  { %v1226_v30 = vpop.f32.mrf.mxu2  ;;  %943 = vmatmul.msk.f32.gmra.mxu0 %vm132_vm2, %v268_v20  ;;  %950 = vmatmul.msk.f32.gmra.mxu2 %vm132_vm2, %v405_v29 }
 0x111   :  { %v181_v31 = vsel %vm174_vm3, %v1226_v30, -inf }
 0x114   :  { %182 = vmax.xlane.f32.xlu0 %v181_v31 }
 0x117   :  { %v409_v36 = vpop.permute.xlu0 %408  ;;  %v544_v38 = vpop.permute.xlu1 %543 }
 0x118   :  { %v1232_v34 = vpop.f32.mrf.mxu2  ;;  %944 = vmatmul.msk.f32.gmra.mxu0 %vm132_vm2, %v270_v22  ;;  %951 = vmatmul.msk.f32.gmra.mxu2 %vm132_vm2, %v407_v33  ;;  %v220_v22 = vld [vmem:[%s1511_s6 + $0x8] sm:$0xff]  ;;  %s1104_s6 = smov 8  }
 0x119   :  { %v184_v35 = vsel %vm174_vm3, %v1232_v34, -inf  ;;  %v1315_v23 = vpack.i.bf16 %v219_v21, %v220_v22  ;;  %247 = vmatpush.msrb.mxu3 %v220_v22 }
 0x11a   :  { %185 = vmax.xlane.f32.xlu2 %v184_v35 }
 0x11b   :  { %248 = vmatpush.msrb.mxu3 %v219_v21 }
 0x120   :  { %952 = vmatmul.msk.f32.gmra.mxu2 %vm132_vm2, %v409_v36  ;;  %957 = vmatmul.msk.f32.vlgmr.msra.gmra.mxu0 %vm132_vm2, %v540_v32 }
 0x128   :  { %958 = vmatmul.msk.f32.gmra.mxu0 %vm132_vm2, %v542_v37 }
 0x130   :  { %959 = vmatmul.msk.f32.gmra.mxu0 %vm132_vm2, %v544_v38 }
 0x138   :  { %960 = vmatmul.msk.f32.gmra.mxu0 %vm132_vm2, %v546_v39 }
 0x17d   :  { %v1243_v40 = vpop.f32.mrf.mxu0  ;;  %v180_v43 = vpop.xlane.xlu2 %179 }
 0x17e   :  { %v308_v41 = vsel %vm174_vm3, %v1243_v40, -inf  ;;  %v188_v46 = vsub.f32 %v165_v25, %v180_v43 }
 0x17f   :  { %309 = vmax.xlane.f32.xlu1 %v308_v41  ;;  %v177_v42 = vpop.xlane.xlu0 %176 }
 0x180   :  { %v187_v44 = vsub.f32 %v162_v27, %v177_v42  ;;  %v193_v49 = vmul.f32 1.442695, %v188_v46 }
 0x182   :  { %v191_v45 = vmul.f32 1.442695, %v187_v44 }
 0x184   :  { %1001 = vpow2.f32 %v191_v45 }
 0x185   :  { %v1247_v47 = vpop.f32.mrf.mxu0  ;;  %1003 = vpow2.f32 %v193_v49 }
 0x186   :  { %v311_v48 = vsel %vm174_vm3, %v1247_v47, -inf }
 0x187   :  { %312 = vmax.xlane.f32.xlu2 %v311_v48  ;;  %v183_v5 = vpop.xlane.xlu0 %182 }
 0x188   :  { %v189_v7 = vsub.f32 %v1226_v30, %v183_v5 }
 0x18a   :  { %v1251_v50 = vpop.eup %1001  ;;  %v195_v11 = vmul.f32 1.442695, %v189_v7 }
 0x18b   :  { %v1253_v51 = vpop.f32.mrf.mxu2  ;;  %v199_v52 = vsel %vm174_vm3, %v1251_v50, 0.0  ;;  %v1261_v55 = vpop.eup %1003 }
 0x18c   :  { %200 = vadd.xlane.f32.xlu0 %v199_v52  ;;  %v447_v53 = vsel %vm174_vm3, %v1253_v51, -inf  ;;  %v202_v57 = vsel %vm174_vm3, %v1261_v55, 0.0  ;;  %1005 = vpow2.f32 %v195_v11 }
 0x18d   :  { %448 = vmax.xlane.f32.xlu1 %v447_v53  ;;  %v1259_v54 = vpop.f32.mrf.mxu0  ;;  %v186_v12 = vpop.xlane.xlu2 %185 }
 0x18e   :  { %v314_v62 = vsel %vm174_vm3, %v1259_v54, -inf  ;;  %v190_v13 = vsub.f32 %v1232_v34, %v186_v12 }
 0x190   :  { %v197_v16 = vmul.f32 1.442695, %v190_v13 }
 0x192   :  { %v1301_v17 = vpop.eup %1005  ;;  %1007 = vpow2.f32 %v197_v16 }
 0x193   :  { %v1263_v56 = vpop.f32.mrf.mxu2  ;;  %v205_v18 = vsel %vm174_vm3, %v1301_v17, 0.0 }
 0x194   :  { %v450_v58 = vsel %vm174_vm3, %v1263_v56, -inf }
 0x195   :  { %203 = vadd.xlane.f32.xlu1 %v202_v57  ;;  %v1269_v59 = vpop.f32.mrf.mxu0  ;;  %451 = vmax.xlane.f32.xlu0 %v450_v58 }
 0x196   :  { %v317_v0 = vsel %vm174_vm3, %v1269_v59, -inf }
 0x198   :  { %v1305_v19 = vpop.eup %1007 }
 0x199   :  { %v208_v20 = vsel %vm174_vm3, %v1305_v19, 0.0 }
 0x19b   :  { %v1271_v60 = vpop.f32.mrf.mxu2 }
 0x19c   :  { %v453_v61 = vsel %vm174_vm3, %v1271_v60, -inf }
 0x19d   :  { %454 = vmax.xlane.f32.xlu2 %v453_v61  ;;  %315 = vmax.xlane.f32.xlu1 %v314_v62  ;;  %v1277_v63 = vpop.f32.mrf.mxu0 }
 0x19e   :  { %318 = vmax.xlane.f32.xlu0 %v317_v0  ;;  %v584_v6 = vsel %vm174_vm3, %v1277_v63, -inf }
 0x1a3   :  { %v1281_v1 = vpop.f32.mrf.mxu2 }
 0x1a4   :  { %v456_v2 = vsel %vm174_vm3, %v1281_v1, -inf }
 0x1a5   :  { %457 = vmax.xlane.f32.xlu2 %v456_v2  ;;  %v1285_v3 = vpop.f32.mrf.mxu0 }
 0x1a6   :  { %v587_v4 = vsel %vm174_vm3, %v1285_v3, -inf }
 0x1a7   :  { %588 = vmax.xlane.f32.xlu1 %v587_v4 }
 0x1ad   :  { %585 = vmax.xlane.f32.xlu2 %v584_v6  ;;  %v1292_v9 = vpop.f32.mrf.mxu0 }
 0x1ae   :  { %v590_v10 = vsel %vm174_vm3, %v1292_v9, -inf }
 0x1af   :  { %591 = vmax.xlane.f32.xlu1 %v590_v10 }
 0x1b5   :  { %v1297_v14 = vpop.f32.mrf.mxu0 }
 0x1b6   :  { %v593_v15 = vsel %vm174_vm3, %v1297_v14, -inf }
 0x1b7   :  { %594 = vmax.xlane.f32.xlu2 %v593_v15 }
 0x1bf   :  { %206 = vadd.xlane.f32.xlu2 %v205_v18 }
 0x1c7   :  { %209 = vadd.xlane.f32.xlu2 %v208_v20 }
 0x1df   :  { %987 = vrot.lane.b32.xlu2 %v1315_v23, %s1102_s4 }
 0x1f2   :  { %v310_v24 = vpop.xlane.xlu1 %309 }
 0x1f3   :  { %v320_v25 = vsub.f32 %v1243_v40, %v310_v24 }
 0x1f5   :  { %v324_v26 = vmul.f32 1.442695, %v320_v25 }
 0x1f7   :  { %1009 = vpow2.f32 %v324_v26 }
 0x1fa   :  { %v313_v27 = vpop.xlane.xlu2 %312 }
 0x1fb   :  { %v321_v28 = vsub.f32 %v1247_v47, %v313_v27 }
 0x1fd   :  { %v1321_v29 = vpop.eup %1009  ;;  %v326_v30 = vmul.f32 1.442695, %v321_v28 }
 0x1fe   :  { %v332_v31 = vsel %vm174_vm3, %v1321_v29, 0.0 }
 0x1ff   :  { %1011 = vpow2.f32 %v326_v30  ;;  %333 = vadd.xlane.f32.xlu0 %v332_v31  ;;  %v201_v32 = vpop.xlane.xlu0 %200 }
 0x200   :  { %1013 = vrcp.f32 %v201_v32  ;;  %v449_v33 = vpop.xlane.xlu1 %448 }
 0x201   :  { %v459_v6 = vsub.f32 %v1253_v51, %v449_v33 }
 0x203   :  { %v463_v11 = vmul.f32 1.442695, %v459_v6 }
 0x205   :  { %v1325_v34 = vpop.eup %1011 }
 0x206   :  { %v1014_v35 = vpop.eup %1013  ;;  %v335_v36 = vsel %vm174_vm3, %v1325_v34, 0.0 }
 0x207   :  { %336 = vadd.xlane.f32.xlu1 %v335_v36  ;;  %v215_v37 = vmul.f32 %v1014_v35, %v1251_v50 }
 0x208   :  { %v204_v38 = vpop.xlane.xlu1 %203  ;;  %v452_v39 = vpop.xlane.xlu0 %451 }
 0x209   :  { %1015 = vrcp.f32 %v204_v38  ;;  %v460_v40 = vsub.f32 %v1263_v56, %v452_v39  ;;  %937 = vmatmul.msk.f32.vlgmr.msrb.gmra.mxu3 %vm174_vm3, %v215_v37 }
 0x20b   :  { %v465_v41 = vmul.f32 1.442695, %v460_v40 }
 0x20d   :  { %1017 = vpow2.f32 %v465_v41 }
 0x20f   :  { %v1016_v42 = vpop.eup %1015 }
 0x210   :  { %v455_v43 = vpop.xlane.xlu2 %454  ;;  %v316_v44 = vpop.xlane.xlu1 %315  ;;  %v216_v45 = vmul.f32 %v1016_v42, %v1261_v55 }
 0x211   :  { %v322_v46 = vsub.f32 %v1259_v54, %v316_v44  ;;  %v319_v47 = vpop.xlane.xlu0 %318  ;;  %v461_v12 = vsub.f32 %v1271_v60, %v455_v43 }
 0x212   :  { %938 = vmatmul.msk.f32.gmra.mxu3 %vm174_vm3, %v216_v45  ;;  %v323_v50 = vsub.f32 %v1269_v59, %v319_v47 }
 0x213   :  { %v1335_v48 = vpop.eup %1017  ;;  %v328_v49 = vmul.f32 1.442695, %v322_v46  ;;  %982 = vrot.lane.b32.xlu0 %v1315_v23, %s1101_s0  ;;  %v467_v15 = vmul.f32 1.442695, %v461_v12 }
 0x214   :  { %v474_v52 = vsel %vm174_vm3, %v1335_v48, 0.0  ;;  %v330_v53 = vmul.f32 1.442695, %v323_v50 }
 0x215   :  { %475 = vadd.xlane.f32.xlu1 %v474_v52  ;;  %1019 = vpow2.f32 %v328_v49 }
 0x216   :  { %1021 = vpow2.f32 %v330_v53 }
 0x218   :  { %v458_v55 = vpop.xlane.xlu2 %457 }
 0x219   :  { %v462_v21 = vsub.f32 %v1281_v1, %v458_v55 }
 0x21a   :  { %v589_v56 = vpop.xlane.xlu1 %588 }
 0x21b   :  { %v597_v54 = vsub.f32 %v1285_v3, %v589_v56  ;;  %v1343_v57 = vpop.eup %1019  ;;  %v469_v60 = vmul.f32 1.442695, %v462_v21  ;;  %v1415_v21 = vpop.f32.mrf.mxu3 }
 0x21c   :  { %v338_v61 = vsel %vm174_vm3, %v1343_v57, 0.0  ;;  %v1348_v0 = vpop.eup %1021 }
 0x21d   :  { %v602_v58 = vmul.f32 1.442695, %v597_v54  ;;  %339 = vadd.xlane.f32.xlu1 %v338_v61  ;;  %v341_v3 = vsel %vm174_vm3, %v1348_v0, 0.0 }
 0x21f   :  { %1023 = vpow2.f32 %v602_v58 }
 0x220   :  { %v586_v59 = vpop.xlane.xlu2 %585 }
 0x221   :  { %v596_v62 = vsub.f32 %v1277_v63, %v586_v59 }
 0x222   :  { %v592_v31 = vpop.xlane.xlu1 %591 }
 0x223   :  { %v600_v2 = vmul.f32 1.442695, %v596_v62  ;;  %v598_v32 = vsub.f32 %v1292_v9, %v592_v31 }
 0x225   :  { %v1350_v4 = vpop.eup %1023  ;;  %1025 = vpow2.f32 %v600_v2  ;;  %342 = vadd.xlane.f32.xlu1 %v341_v3 }
 0x226   :  { %v611_v5 = vsel %vm174_vm3, %v1350_v4, 0.0  ;;  %1027 = vpow2.f32 %v463_v11 }
 0x227   :  { %612 = vadd.xlane.f32.xlu2 %v611_v5 }
 0x22a   :  { %v595_v7 = vpop.xlane.xlu2 %594 }
 0x22b   :  { %v1357_v10 = vpop.eup %1025  ;;  %v599_v27 = vsub.f32 %v1297_v14, %v595_v7 }
 0x22c   :  { %v608_v63 = vsel %vm174_vm3, %v1357_v10, 0.0  ;;  %v1362_v16 = vpop.eup %1027 }
 0x22d   :  { %609 = vadd.xlane.f32.xlu1 %v608_v63  ;;  %v471_v22 = vsel %vm174_vm3, %v1362_v16, 0.0 }
 0x232   :  { %v207_v13 = vpop.xlane.xlu2 %206 }
 0x233   :  { %1029 = vrcp.f32 %v207_v13 }
 0x234   :  { %1031 = vpow2.f32 %v467_v15 }
 0x239   :  { %v1030_v18 = vpop.eup %1029 }
 0x23a   :  { %v210_v20 = vpop.xlane.xlu2 %209  ;;  %v217_v51 = vmul.f32 %v1030_v18, %v1301_v17  ;;  %v1369_v24 = vpop.eup %1031  ;;  %v606_v17 = vmul.f32 1.442695, %v599_v27 }
 0x23b   :  { %1033 = vrcp.f32 %v210_v20  ;;  %v477_v1 = vsel %vm174_vm3, %v1369_v24, 0.0 }
 0x23c   :  { %939 = vmatmul.msk.f32.gmra.mxu3 %vm174_vm3, %v217_v51  ;;  %1035 = vpow2.f32 %v469_v60 }
 0x23d   :  { %472 = vadd.xlane.f32.xlu0 %v471_v22  ;;  %1037 = vpow2.f32 %v606_v17  ;;  %v1417_v22 = vpop.f32.mrf.mxu3 }
 0x241   :  { %v1034_v25 = vpop.eup %1033 }
 0x242   :  { %v218_v26 = vmul.f32 %v1034_v25, %v1305_v19  ;;  %v1378_v28 = vpop.eup %1035  ;;  %v988_v33 = vpop.permute.xlu2 %987 }
 0x243   :  { %v480_v30 = vsel %vm174_vm3, %v1378_v28, 0.0  ;;  %v1382_v19 = vpop.eup %1037  ;;  %v989_v35 = vunpack.i.l.bf16 %v988_v33  ;;  %v990_v36 = vunpack.i.h.bf16 %v988_v33 }
 0x244   :  { %940 = vmatmul.msk.f32.gmra.mxu3 %vm174_vm3, %v218_v26  ;;  %v617_v14 = vsel %vm174_vm3, %v1382_v19, 0.0 }
 0x245   :  { %478 = vadd.xlane.f32.xlu0 %v477_v1  ;;  %523 = vmatpush.msra.mxu3 %v989_v35 }
 0x246   :  { %992 = vrot.lane.b32.xlu1 %v1315_v23, %s1103_s12  ;;  %v604_v23 = vmul.f32 1.442695, %v598_v32 }
 0x247   :  { %524 = vmatpush.msra.mxu3 %v990_v36 }
 0x248   :  { %1039 = vpow2.f32 %v604_v23 }
 0x24d   :  { %481 = vadd.xlane.f32.xlu0 %v480_v30 }
 0x24e   :  { %v1387_v37 = vpop.eup %1039 }
 0x24f   :  { %v614_v38 = vsel %vm174_vm3, %v1387_v37, 0.0 }
 0x255   :  { %618 = vadd.xlane.f32.xlu0 %v617_v14 }
 0x270   :  { %615 = vadd.xlane.f32.xlu1 %v614_v38  ;;  %v738_v38 = vld [vmem:[%s1512_s7 + $0x10] sm:$0xff] }
 0x272   :  { %v334_v39 = vpop.xlane.xlu0 %333 }
 0x273   :  { %1041 = vrcp.f32 %v334_v39  ;;  %v737_v39 = vld [vmem:[%s1512_s7 + $0x8] sm:$0xff] }
 0x279   :  { %v1042_v42 = vpop.eup %1041 }
 0x27a   :  { %v337_v40 = vpop.xlane.xlu1 %336  ;;  %v348_v45 = vmul.f32 %v1042_v42, %v1321_v29 }
 0x27b   :  { %1043 = vrcp.f32 %v337_v40  ;;  %v736_v40 = vld [vmem:[%s1512_s7] sm:$0xff] }
 0x281   :  { %v1044_v46 = vpop.eup %1043 }
 0x282   :  { %v349_v49 = vmul.f32 %v1044_v46, %v1325_v34 }
 0x285   :  { %v983_v41 = vpop.permute.xlu0 %982 }
 0x286   :  { %v984_v43 = vunpack.i.l.bf16 %v983_v41  ;;  %v985_v9 = vunpack.i.h.bf16 %v983_v41 }
 0x288   :  { %v476_v44 = vpop.xlane.xlu1 %475  ;;  %386 = vmatpush.msrb.mxu1 %v984_v43 }
 0x28a   :  { %387 = vmatpush.msrb.mxu1 %v985_v9 }
 0x28b   :  { %945 = vmatmul.msk.f32.vlgmr.msrb.gmra.mxu1 %vm174_vm3, %v348_v45 }
 0x290   :  { %v340_v47 = vpop.xlane.xlu1 %339 }
 0x291   :  { %1045 = vrcp.f32 %v340_v47 }
 0x293   :  { %946 = vmatmul.msk.f32.gmra.mxu1 %vm174_vm3, %v349_v49 }
 0x297   :  { %v1046_v50 = vpop.eup %1045 }
 0x298   :  { %v343_v52 = vpop.xlane.xlu1 %342  ;;  %v350_v53 = vmul.f32 %v1046_v50, %v1343_v57 }
 0x299   :  { %1047 = vrcp.f32 %v343_v52 }
 0x29a   :  { %v613_v61 = vpop.xlane.xlu2 %612 }
 0x29b   :  { %947 = vmatmul.msk.f32.gmra.mxu1 %vm174_vm3, %v350_v53 }
 0x29f   :  { %v1048_v55 = vpop.eup %1047 }
 0x2a0   :  { %v351_v29 = vmul.f32 %v1048_v55, %v1348_v0  ;;  %v610_v54 = vpop.xlane.xlu1 %609 }
 0x2a3   :  { %948 = vmatmul.msk.f32.gmra.mxu1 %vm174_vm3, %v351_v29 }
 0x2b0   :  { %v473_v56 = vpop.xlane.xlu0 %472 }
 0x2b1   :  { %1049 = vrcp.f32 %v473_v56 }
 0x2b2   :  { %1051 = vrcp.f32 %v610_v54 }
 0x2b3   :  { %1053 = vrcp.f32 %v476_v44 }
 0x2b4   :  { %1055 = vrcp.f32 %v613_v61 }
 0x2b7   :  { %v1050_v34 = vpop.eup %1049 }
 0x2b8   :  { %v487_v58 = vmul.f32 %v1050_v34, %v1362_v16  ;;  %v993_v59 = vpop.permute.xlu1 %992  ;;  %v1052_v62 = vpop.eup %1051 }
 0x2b9   :  { %v994_v57 = vunpack.i.l.bf16 %v993_v59  ;;  %v479_v2 = vpop.xlane.xlu0 %478  ;;  %v995_v3 = vunpack.i.h.bf16 %v993_v59  ;;  %v1054_v0 = vpop.eup %1053  ;;  %v624_v5 = vmul.f32 %v1052_v62, %v1357_v10 }
 0x2ba   :  { %953 = vmatmul.msk.f32.vlgmr.msra.gmra.mxu3 %vm174_vm3, %v487_v58  ;;  %1057 = vrcp.f32 %v479_v2  ;;  %v488_v6 = vmul.f32 %v1054_v0, %v1335_v48  ;;  %v1056_v7 = vpop.eup %1055  ;;  %v996_v0 = vld [vmem:[%s1507_s2] ss:$0 sm:$0xff] }
 0x2bb   :  { %660 = vmatpush.msra.mxu1 %v994_v57  ;;  %v625_v12 = vmul.f32 %v1056_v7, %v1350_v4  ;;  %v83_v7 = vadd.f32 %v996_v0, %v1194_v8 }
 0x2bd   :  { %661 = vmatpush.msra.mxu1 %v995_v3 }
 0x2be   :  { %961 = vmatmul.msk.f32.vlgmr.msra.gmra.mxu1 %vm174_vm3, %v624_v5  ;;  %v998_v5 = vld [vmem:[%s1513_s8] ss:$0 sm:$0xff] }
 0x2c0   :  { %v1058_v11 = vpop.eup %1057 }
 0x2c1   :  { %v482_v63 = vpop.xlane.xlu0 %481  ;;  %v489_v13 = vmul.f32 %v1058_v11, %v1369_v24  ;;  %v1420_v24 = vpop.f32.mrf.mxu3 }
 0x2c2   :  { %954 = vmatmul.msk.f32.gmra.mxu3 %vm174_vm3, %v488_v6  ;;  %1059 = vrcp.f32 %v482_v63 }
 0x2c6   :  { %962 = vmatmul.msk.f32.gmra.mxu1 %vm174_vm3, %v625_v12 }
 0x2c8   :  { %v1060_v10 = vpop.eup %1059 }
 0x2c9   :  { %v490_v15 = vmul.f32 %v1060_v10, %v1378_v28  ;;  %v619_v16 = vpop.xlane.xlu0 %618  ;;  %v250_v26 = vpop.f32.mrf.mxu3  ;;  %v86_v10 = vadd.f32 %v996_v0, %v1415_v21 }
 0x2ca   :  { %955 = vmatmul.msk.f32.gmra.mxu3 %vm174_vm3, %v489_v13 }
 0x2d1   :  { %v253_v27 = vpop.f32.mrf.mxu3 }
 0x2d2   :  { %956 = vmatmul.msk.f32.gmra.mxu3 %vm174_vm3, %v490_v15 }
 0x2d9   :  { %v256_v17 = vpop.f32.mrf.mxu3 }
 0x2e1   :  { %v259_v30 = vpop.f32.mrf.mxu3 }
 0x2e3   :  { %v616_v48 = vpop.xlane.xlu1 %615 }
 0x2e4   :  { %1061 = vrcp.f32 %v616_v48 }
 0x2e5   :  { %1063 = vrcp.f32 %v619_v16 }
 0x2ea   :  { %v1062_v18 = vpop.eup %1061 }
 0x2eb   :  { %v626_v20 = vmul.f32 %v1062_v18, %v1387_v37  ;;  %v1064_v4 = vpop.eup %1063  ;;  %v739_v37 = vld [vmem:[%s1512_s7 + $0x18] sm:$0xff] }
 0x2ec   :  { %v627_v51 = vmul.f32 %v1064_v4, %v1382_v19  ;;  %769 = vmatpush.msra.mxu2 %v739_v37 }
 0x2ed   :  { %963 = vmatmul.msk.f32.gmra.mxu1 %vm174_vm3, %v626_v20  ;;  %v89_v20 = vadd.f32 %v996_v0, %v1417_v22 }
 0x2ee   :  { %770 = vmatpush.msra.mxu2 %v738_v38 }
 0x2f0   :  { %771 = vmatpush.msra.mxu2 %v737_v39 }
 0x2f2   :  { %772 = vmatpush.msra.mxu2 %v736_v40 }
 0x2f5   :  { %964 = vmatmul.msk.f32.gmra.mxu1 %vm174_vm3, %v627_v51 }
 0x308   :  { %v389_v60 = vpop.f32.mrf.mxu1 }
 0x309   :  { %679 = vrot.lane.b32.xlu0 %v389_v60, %s1104_s6 }
 0x310   :  { %v392_v25 = vpop.f32.mrf.mxu1 }
 0x311   :  { %681 = vrot.lane.b32.xlu1 %v392_v25, %s1104_s6  ;;  %v92_v25 = vadd.f32 %v996_v0, %v1420_v24 }
 0x318   :  { %v395_v1 = vpop.f32.mrf.mxu1 }
 0x320   :  { %v398_v28 = vpop.f32.mrf.mxu1 }
 0x33b   :  { %v663_v19 = vpop.f32.mrf.mxu1 }
 0x33c   :  { %711 = vrot.lane.b32.xlu0 %v663_v19, %s1105_s22 }
 0x33d   :  { %v526_v14 = vpop.f32.mrf.mxu3 }
 0x33e   :  { %695 = vrot.lane.b32.xlu2 %v526_v14, %s1106_s23 }
 0x343   :  { %v666_v31 = vpop.f32.mrf.mxu1 }
 0x344   :  { %713 = vrot.lane.b32.xlu0 %v666_v31, %s1105_s22 }
 0x345   :  { %v529_v32 = vpop.f32.mrf.mxu3 }
 0x346   :  { %697 = vrot.lane.b32.xlu2 %v529_v32, %s1106_s23 }
 0x34d   :  { %v532_v33 = vpop.f32.mrf.mxu3 }
 0x34e   :  { %683 = vrot.lane.b32.xlu2 %v395_v1, %s1104_s6  ;;  %699 = vrot.lane.b32.xlu0 %v532_v33, %s1106_s23  ;;  %v1107_v1 = vmov 32.0  }
 0x34f   :  { %1065 = vrcp.f32 %v1107_v1 }
 0x355   :  { %v535_v35 = vpop.f32.mrf.mxu3 }
 0x356   :  { %701 = vrot.lane.b32.xlu1 %v535_v35, %s1106_s23  ;;  %685 = vrot.lane.b32.xlu0 %v398_v28, %s1104_s6 }
 0x36a   :  { %v669_v36 = vpop.f32.mrf.mxu1 }
 0x36b   :  { %715 = vrot.lane.b32.xlu2 %v669_v36, %s1105_s22 }
 0x372   :  { %v672_v23 = vpop.f32.mrf.mxu1 }
 0x373   :  { %717 = vrot.lane.b32.xlu2 %v672_v23, %s1105_s22 }
 0x37b   :  { %v680_v41 = vpop.permute.xlu0 %679 }
 0x37c   :  { %v723_v43 = vsel %vm132_vm2, %v250_v26, %v680_v41 }
 0x383   :  { %v682_v46 = vpop.permute.xlu1 %681 }
 0x384   :  { %v724_v49 = vsel %vm132_vm2, %v253_v27, %v682_v46 }
 0x398   :  { %v696_v42 = vpop.permute.xlu2 %695 }
 0x399   :  { %v727_v9 = vsel %vm174_vm3, %v723_v43, %v696_v42 }
 0x3a0   :  { %v698_v47 = vpop.permute.xlu2 %697 }
 0x3a1   :  { %v728_v50 = vsel %vm174_vm3, %v724_v49, %v698_v47 }
 0x3a8   :  { %v684_v55 = vpop.permute.xlu2 %683 }
 0x3a9   :  { %v725_v56 = vsel %vm132_vm2, %v256_v17, %v684_v55  ;;  %v1066_v17 = vpop.eup %1065 }
 0x3aa   :  { %v803_v28 = vmul.f32 32.0, %v1066_v17  ;;  %vm807_vm6 = vweird.f32 %v1066_v17 }
 0x3ae   :  { %v712_v44 = vpop.permute.xlu0 %711 }
 0x3af   :  { %v732_v45 = vsel %vm731_vm4, %v727_v9, %v712_v44 }
 0x3b0   :  { %965 = vmatmul.msk.f32.vlgmr.msra.gmra.mxu2 %vm744_vm5, %v732_v45 }
 0x3b6   :  { %v714_v52 = vpop.permute.xlu0 %713 }
 0x3b7   :  { %v733_v53 = vsel %vm731_vm4, %v728_v50, %v714_v52 }
 0x3b8   :  { %966 = vmatmul.msk.f32.gmra.mxu2 %vm744_vm5, %v733_v53 }
 0x3c0   :  { %v700_v29 = vpop.permute.xlu0 %699 }
 0x3c1   :  { %v729_v54 = vsel %vm174_vm3, %v725_v56, %v700_v29 }
 0x3c5   :  { %v716_v34 = vpop.permute.xlu2 %715 }
 0x3c6   :  { %v734_v58 = vsel %vm731_vm4, %v729_v54, %v716_v34 }
 0x3c7   :  { %967 = vmatmul.msk.f32.gmra.mxu2 %vm744_vm5, %v734_v58 }
 0x3c8   :  { %v686_v61 = vpop.permute.xlu0 %685  ;;  %v702_v59 = vpop.permute.xlu1 %701 }
 0x3c9   :  { %v726_v62 = vsel %vm132_vm2, %v259_v30, %v686_v61  ;;  %v804_v30 = vsub.f32 1.0, %v803_v28 }
 0x3ca   :  { %v730_v2 = vsel %vm174_vm3, %v726_v62, %v702_v59 }
 0x3cb   :  { %v805_v19 = vmul.f32 %v1066_v17, %v804_v30 }
 0x3cd   :  { %v718_v57 = vpop.permute.xlu2 %717  ;;  %v806_v22 = vadd.f32 %v1066_v17, %v805_v19 }
 0x3ce   :  { %v735_v3 = vsel %vm731_vm4, %v730_v2, %v718_v57 }
 0x3cf   :  { %968 = vmatmul.msk.f32.gmra.mxu2 %vm744_vm5, %v735_v3  ;;  %v1467_v14 = vsel %vm807_vm6, %v1066_v17, %v806_v22  ;;  %v999_v3 = vld [vmem:[%s1514_s9] ss:$0 sm:$0xff]  ;;  %s1108_s9 = smov [#allocation2]  }
 0x433   :  { %v774_v6 = vpop.f32.mrf.mxu2 }
 0x434   :  { %v775_v63 = vadd.f32 %v998_v5, %v774_v6  ;;  %v1000_v6 = vld [vmem:[%s1515_s10] ss:$0 sm:$0xff]  ;;  %s909_s10 = sshll.u32 %s1108_s9, 4  ;;  %s910_s10 = int_to_ptr.vmem [resolvable:$true] %s909_s10 }
 0x436   :  { %v786_v11 = vadd.f32 %v775_v63, %v83_v7 }
 0x438   :  { %v790_v12 = vsel %vm744_vm5, %v786_v11, 0.0 }
 0x439   :  { %791 = vadd.xlane.f32.xlu0 %v790_v12 }
 0x43b   :  { %v777_v13 = vpop.f32.mrf.mxu2 }
 0x43c   :  { %v778_v15 = vadd.f32 %v998_v5, %v777_v13 }
 0x43e   :  { %v787_v48 = vadd.f32 %v778_v15, %v86_v10 }
 0x440   :  { %v793_v16 = vsel %vm744_vm5, %v787_v48, 0.0 }
 0x441   :  { %794 = vadd.xlane.f32.xlu1 %v793_v16 }
 0x44a   :  { %v780_v18 = vpop.f32.mrf.mxu2 }
 0x44b   :  { %v781_v4 = vadd.f32 %v998_v5, %v780_v18 }
 0x44d   :  { %v788_v51 = vadd.f32 %v781_v4, %v89_v20 }
 0x44f   :  { %v796_v8 = vsel %vm744_vm5, %v788_v51, 0.0 }
 0x450   :  { %797 = vadd.xlane.f32.xlu2 %v796_v8 }
 0x452   :  { %v783_v60 = vpop.f32.mrf.mxu2 }
 0x453   :  { %v784_v26 = vadd.f32 %v998_v5, %v783_v60 }
 0x455   :  { %v789_v27 = vadd.f32 %v784_v26, %v92_v25 }
 0x457   :  { %v799_v21 = vsel %vm744_vm5, %v789_v27, 0.0 }
 0x458   :  { %800 = vadd.xlane.f32.xlu0 %v799_v21 }
 0x4ac   :  { %v792_v31 = vpop.xlane.xlu0 %791 }
 0x4ad   :  { %v809_v32 = vmul.f32 %v1467_v14, %v792_v31 }
 0x4af   :  { %v813_v33 = vsub.f32 %v786_v11, %v809_v32 }
 0x4b1   :  { %v817_v24 = vmul.f32 %v813_v33, %v813_v33 }
 0x4b3   :  { %v821_v35 = vsel %vm744_vm5, %v817_v24, 0.0 }
 0x4b4   :  { %v795_v36 = vpop.xlane.xlu1 %794  ;;  %822 = vadd.xlane.f32.xlu1 %v821_v35 }
 0x4b5   :  { %v810_v23 = vmul.f32 %v1467_v14, %v795_v36 }
 0x4b7   :  { %v814_v37 = vsub.f32 %v787_v48, %v810_v23 }
 0x4b9   :  { %v818_v38 = vmul.f32 %v814_v37, %v814_v37 }
 0x4bb   :  { %v824_v39 = vsel %vm744_vm5, %v818_v38, 0.0 }
 0x4bc   :  { %825 = vadd.xlane.f32.xlu2 %v824_v39 }
 0x4c3   :  { %v798_v40 = vpop.xlane.xlu2 %797 }
 0x4c4   :  { %v811_v41 = vmul.f32 %v1467_v14, %v798_v40 }
 0x4c6   :  { %v1474_v42 = vsub.f32 %v788_v51, %v811_v41 }
 0x4c8   :  { %v819_v43 = vmul.f32 %v1474_v42, %v1474_v42 }
 0x4ca   :  { %v827_v9 = vsel %vm744_vm5, %v819_v43, 0.0 }
 0x4cb   :  { %828 = vadd.xlane.f32.xlu0 %v827_v9  ;;  %v801_v44 = vpop.xlane.xlu0 %800 }
 0x4cc   :  { %v812_v45 = vmul.f32 %v1467_v14, %v801_v44 }
 0x4ce   :  { %v1480_v46 = vsub.f32 %v789_v27, %v812_v45 }
 0x4d0   :  { %v820_v47 = vmul.f32 %v1480_v46, %v1480_v46 }
 0x4d2   :  { %v830_v49 = vsel %vm744_vm5, %v820_v47, 0.0 }
 0x4d3   :  { %831 = vadd.xlane.f32.xlu1 %v830_v49 }
 0x527   :  { %v823_v50 = vpop.xlane.xlu1 %822 }
 0x528   :  { %v833_v52 = vmul.f32 %v823_v50, %v1467_v14 }
 0x52a   :  { %v837_v53 = vadd.f32 1e-05, %v833_v52 }
 0x52c   :  { %1067 = vrsqrt.f32 %v837_v53  ;;  %vm847_vm8 = vweird.f32 %v837_v53 }
 0x52f   :  { %v826_v55 = vpop.xlane.xlu2 %825 }
 0x530   :  { %v834_v29 = vmul.f32 %v826_v55, %v1467_v14 }
 0x532   :  { %v1068_v56 = vpop.eup %1067  ;;  %v838_v54 = vadd.f32 1e-05, %v834_v29 }
 0x533   :  { %v842_v34 = vmul.f32 %v1068_v56, %v837_v53  ;;  %vm848_vm7 = vweird.f32 %v1068_v56 }
 0x534   :  { %1069 = vrsqrt.f32 %v838_v54  ;;  %vm849_vm9 = vmor %vm847_vm8, %vm848_vm7  ;;  %vm857_vm11 = vweird.f32 %v838_v54 }
 0x535   :  { %v843_v58 = vmul.f32 %v1068_v56, %v842_v34 }
 0x537   :  { %v844_v61 = vmul.f32 0.5, %v843_v58 }
 0x539   :  { %v845_v59 = vsub.f32 1.5, %v844_v61 }
 0x53a   :  { %v1070_v62 = vpop.eup %1069 }
 0x53b   :  { %v846_v57 = vmul.f32 %v1068_v56, %v845_v59  ;;  %v852_v2 = vmul.f32 %v1070_v62, %v838_v54  ;;  %vm858_vm10 = vweird.f32 %v1070_v62 }
 0x53c   :  { %vm859_vm12 = vmor %vm857_vm11, %vm858_vm10 }
 0x53d   :  { %v850_v0 = vsel %vm849_vm9, %v1068_v56, %v846_v57  ;;  %v853_v5 = vmul.f32 %v1070_v62, %v852_v2 }
 0x53e   :  { %v881_v7 = vmul.f32 %v850_v0, %v813_v33  ;;  %v829_v63 = vpop.xlane.xlu0 %828 }
 0x53f   :  { %v854_v11 = vmul.f32 0.5, %v853_v5  ;;  %v835_v12 = vmul.f32 %v829_v63, %v1467_v14 }
 0x540   :  { %v889_v13 = vmul.f32 %v999_v3, %v881_v7 }
 0x541   :  { %v855_v10 = vsub.f32 1.5, %v854_v11  ;;  %v839_v15 = vadd.f32 1e-05, %v835_v12 }
 0x542   :  { %v897_v48 = vadd.f32 %v1000_v6, %v889_v13 }
 0x543   :  { %v856_v16 = vmul.f32 %v1070_v62, %v855_v10  ;;  %1071 = vrsqrt.f32 %v839_v15  ;;  %vm867_vm14 = vweird.f32 %v839_v15 }
 0x544   :  { %901 = vst.msk [vmem:[#allocation2] sm:$0xff] %vm744_vm5, %v897_v48 }
 0x545   :  { %v860_v18 = vsel %vm859_vm12, %v1070_v62, %v856_v16 }
 0x546   :  { %v882_v20 = vmul.f32 %v860_v18, %v814_v37  ;;  %v832_v4 = vpop.xlane.xlu1 %831 }
 0x547   :  { %v836_v51 = vmul.f32 %v832_v4, %v1467_v14 }
 0x548   :  { %v890_v8 = vmul.f32 %v999_v3, %v882_v20 }
 0x549   :  { %v1072_v60 = vpop.eup %1071  ;;  %v840_v25 = vadd.f32 1e-05, %v836_v51 }
 0x54a   :  { %v898_v26 = vadd.f32 %v1000_v6, %v890_v8  ;;  %v862_v27 = vmul.f32 %v1072_v60, %v839_v15  ;;  %vm868_vm13 = vweird.f32 %v1072_v60 }
 0x54b   :  { %1073 = vrsqrt.f32 %v840_v25  ;;  %vm869_vm15 = vmor %vm867_vm14, %vm868_vm13  ;;  %vm877_vm1 = vweird.f32 %v840_v25 }
 0x54c   :  { %902 = vst.msk [vmem:[#allocation2 + $0x8] sm:$0xff] %vm744_vm5, %v898_v26  ;;  %v863_v21 = vmul.f32 %v1072_v60, %v862_v27 }
 0x54e   :  { %v864_v1 = vmul.f32 0.5, %v863_v21 }
 0x550   :  { %v865_v17 = vsub.f32 1.5, %v864_v1 }
 0x551   :  { %v1074_v28 = vpop.eup %1073 }
 0x552   :  { %v866_v30 = vmul.f32 %v1072_v60, %v865_v17  ;;  %v872_v19 = vmul.f32 %v1074_v28, %v840_v25  ;;  %vm878_vm0 = vweird.f32 %v1074_v28 }
 0x553   :  { %vm879_vm2 = vmor %vm877_vm1, %vm878_vm0 }
 0x554   :  { %v870_v22 = vsel %vm869_vm15, %v1072_v60, %v866_v30  ;;  %v873_v31 = vmul.f32 %v1074_v28, %v872_v19 }
 0x555   :  { %v883_v14 = vmul.f32 %v870_v22, %v1474_v42 }
 0x556   :  { %v874_v32 = vmul.f32 0.5, %v873_v31 }
 0x557   :  { %v891_v33 = vmul.f32 %v999_v3, %v883_v14 }
 0x558   :  { %v875_v24 = vsub.f32 1.5, %v874_v32 }
 0x559   :  { %v899_v35 = vadd.f32 %v1000_v6, %v891_v33 }
 0x55a   :  { %v876_v36 = vmul.f32 %v1074_v28, %v875_v24 }
 0x55b   :  { %903 = vst.msk [vmem:[#allocation2 + $0x10] sm:$0xff] %vm744_vm5, %v899_v35 }
 0x55c   :  { %v880_v23 = vsel %vm879_vm2, %v1074_v28, %v876_v36 }
 0x55d   :  { %v884_v37 = vmul.f32 %v880_v23, %v1480_v46 }
 0x55f   :  { %v892_v38 = vmul.f32 %v999_v3, %v884_v37 }
 0x561   :  { %v900_v39 = vadd.f32 %v1000_v6, %v892_v38 }
 0x563   :  { %904 = vst.msk [vmem:[#allocation2 + $0x18] sm:$0xff] %vm744_vm5, %v900_v39 }
 0x564   :  { %917 = dma.vmem_to_hbm [thread:$0]  %s910_s10, 512, %s912_s16, [#allocation3], %s1109_s17, %s1109_s17, %s1104_s6  }
 0x565   :  { %1099 = dma.done.wait [#allocation3], 512  }
 0x566   :  { %1100 = vsyncadd [#allocation3], 4294966784 }
 0x567   :  { %922 = vsyncpa [#allocation3], 1 }

</bundles_post_ra>
